<compile_context>
chip_gen: v7x
topology: tpu7x:2x2x1
jax: 0.10.0
libtpu: 0.0.40
codegen_flags: <defaults>
</compile_context>

<pallas_src>
import functools
import math

import jax
import jax.numpy as jnp
from jax.experimental import pallas as pl
from jax.experimental.pallas import tpu as pltpu

EPS = 1e-5  # nn.LayerNorm default

_LANE = 128
_SUBLANE = 8
_MAX_BLOCK_ROWS = 1024
_VMEM_TILE_BUDGET = 32 * 1024 * 1024      # conservative across v5e / v6e / v7x
_VMEM_LIMIT_BYTES = 48 * 1024 * 1024      # scoped VMEM limit (< v7x 64 MiB physical)
_FUSE_WEIGHT_BYTES_CAP = 16 * 1024 * 1024  # max (double-buffered) weight bytes to fuse


def _round_up(x, m):
    return (x + m - 1) // m * m


def _pick_block_rows(rows, bytes_per_row, resident_bytes):
    """Largest multiple of 8 rows whose double-buffered tiles fit the VMEM budget."""
    avail = _VMEM_TILE_BUDGET - resident_bytes
    if avail < _SUBLANE * bytes_per_row:
        avail = _SUBLANE * bytes_per_row
    br = avail // bytes_per_row
    br = min(br, _MAX_BLOCK_ROWS, _round_up(rows, _SUBLANE))
    br = max(br, _SUBLANE)
    return int(br - br % _SUBLANE)


def _pad2(a, rows_p, cols_p):
    r, c = a.shape
    if r == rows_p and c == cols_p:
        return a
    return jnp.pad(a, ((0, rows_p - r), (0, cols_p - c)))


def _layernorm_tile(x_ref, gamma_ref, beta_ref, dim, dim_padded):
    """LayerNorm of one (block_rows, dim_padded) tile; padded lanes come out 0."""
    x = x_ref[...].astype(jnp.float32)
    if dim_padded != dim:
        lane = jax.lax.broadcasted_iota(jnp.int32, x.shape, 1)
        xm = jnp.where(lane < dim, x, 0.0)
    else:
        xm = x
    inv_n = jnp.float32(1.0 / dim)
    # Independent reductions (overlap on the XLU), f32 accumulation.
    s1 = jnp.sum(xm, axis=-1, keepdims=True)
    s2 = jnp.sum(xm * xm, axis=-1, keepdims=True)
    mean = s1 * inv_n
    var = jnp.maximum(s2 * inv_n - mean * mean, 0.0)
    inv = jax.lax.rsqrt(var + EPS)
    gamma = gamma_ref[...].astype(jnp.float32)  # zero in padded lanes
    beta = beta_ref[...].astype(jnp.float32)    # zero in padded lanes
    return (x - mean) * inv * gamma + beta


def _layernorm_kernel(x_ref, gamma_ref, beta_ref, o_ref, *, dim, dim_padded):
    y = _layernorm_tile(x_ref, gamma_ref, beta_ref, dim, dim_padded)
    o_ref[...] = y.astype(o_ref.dtype)


def _prenorm_linear_kernel(x_ref, gamma_ref, beta_ref, w_ref, b_ref, o_ref, *,
                           dim, dim_padded):
    y = _layernorm_tile(x_ref, gamma_ref, beta_ref, dim, dim_padded)
    out = jnp.dot(y, w_ref[...].astype(jnp.float32),
                  preferred_element_type=jnp.float32)
    out = out + b_ref[...].astype(jnp.float32)
    o_ref[...] = out.astype(o_ref.dtype)


def layernorm_pallas(x, gamma, beta, *, block_rows=None):
    """LayerNorm over the last dim of x (any leading shape)."""
    orig_shape = x.shape
    dim = orig_shape[-1]
    rows = max(1, math.prod(orig_shape[:-1]))
    dim_p = _round_up(dim, _LANE)

    x2 = _pad2(x.reshape(rows, dim), rows, dim_p)
    gamma2 = _pad2(gamma.reshape(1, dim).astype(jnp.float32), 1, dim_p)
    beta2 = _pad2(beta.reshape(1, dim).astype(jnp.float32), 1, dim_p)

    itemsize = jnp.dtype(x.dtype).itemsize
    bytes_per_row = 2 * dim_p * itemsize + 2 * dim_p * itemsize  # dbl-buf in + out
    resident = 2 * 2 * dim_p * 4                                 # gamma/beta
    if block_rows is None:
        block_rows = _pick_block_rows(rows, bytes_per_row, resident)
    rows_p = _round_up(rows, block_rows)
    if rows_p != rows:
        x2 = jnp.pad(x2, ((0, rows_p - rows), (0, 0)))

    kernel = functools.partial(_layernorm_kernel, dim=dim, dim_padded=dim_p)
    out = pl.pallas_call(
        kernel,
        out_shape=jax.ShapeDtypeStruct((rows_p, dim_p), x.dtype),
        grid_spec=pltpu.PrefetchScalarGridSpec(
            num_scalar_prefetch=0,
            grid=(rows_p // block_rows,),
            in_specs=[
                pl.BlockSpec((block_rows, dim_p), lambda i: (i, 0)),
                pl.BlockSpec((1, dim_p), lambda i: (0, 0)),
                pl.BlockSpec((1, dim_p), lambda i: (0, 0)),
            ],
            out_specs=pl.BlockSpec((block_rows, dim_p), lambda i: (i, 0)),
        ),
        compiler_params=pltpu.CompilerParams(
            dimension_semantics=("parallel",),
            vmem_limit_bytes=_VMEM_LIMIT_BYTES,
        ),
    )(x2, gamma2, beta2)
    return out[:rows, :dim].reshape(orig_shape)


def prenorm_linear_pallas(x, gamma, beta, weight, bias, *, block_rows=None):
    """Fused LayerNorm(x) @ weight + bias. weight: (dim, dout), bias: (dout,)."""
    orig_shape = x.shape
    dim = orig_shape[-1]
    dout = weight.shape[1]
    rows = max(1, math.prod(orig_shape[:-1]))
    dim_p = _round_up(dim, _LANE)
    dout_p = _round_up(dout, _LANE)

    x2 = _pad2(x.reshape(rows, dim), rows, dim_p)
    gamma2 = _pad2(gamma.reshape(1, dim).astype(jnp.float32), 1, dim_p)
    beta2 = _pad2(beta.reshape(1, dim).astype(jnp.float32), 1, dim_p)
    w2 = _pad2(weight, dim_p, dout_p)
    b2 = _pad2(bias.reshape(1, dout), 1, dout_p)

    x_item = jnp.dtype(x.dtype).itemsize
    w_item = jnp.dtype(weight.dtype).itemsize
    bytes_per_row = 2 * dim_p * x_item + 2 * dout_p * x_item     # dbl-buf in + out
    resident = 2 * dim_p * dout_p * w_item + 2 * (2 * dim_p + dout_p) * 4
    if block_rows is None:
        block_rows = _pick_block_rows(rows, bytes_per_row, resident)
    rows_p = _round_up(rows, block_rows)
    if rows_p != rows:
        x2 = jnp.pad(x2, ((0, rows_p - rows), (0, 0)))

    kernel = functools.partial(_prenorm_linear_kernel, dim=dim, dim_padded=dim_p)
    out = pl.pallas_call(
        kernel,
        out_shape=jax.ShapeDtypeStruct((rows_p, dout_p), x.dtype),
        grid_spec=pltpu.PrefetchScalarGridSpec(
            num_scalar_prefetch=0,
            grid=(rows_p // block_rows,),
            in_specs=[
                pl.BlockSpec((block_rows, dim_p), lambda i: (i, 0)),
                pl.BlockSpec((1, dim_p), lambda i: (0, 0)),
                pl.BlockSpec((1, dim_p), lambda i: (0, 0)),
                pl.BlockSpec((dim_p, dout_p), lambda i: (0, 0)),  # weight resident
                pl.BlockSpec((1, dout_p), lambda i: (0, 0)),
            ],
            out_specs=pl.BlockSpec((block_rows, dout_p), lambda i: (i, 0)),
        ),
        compiler_params=pltpu.CompilerParams(
            dimension_semantics=("parallel",),
            vmem_limit_bytes=_VMEM_LIMIT_BYTES,
        ),
    )(x2, gamma2, beta2, w2, b2)
    return out[:rows, :dout].reshape(orig_shape[:-1] + (dout,))


class Linear:
    """Simple y @ W + b used as the wrapped `fn` (fusable into the kernel)."""

    def __init__(self, weight, bias):
        self.weight = weight  # (dim_in, dim_out)
        self.bias = bias      # (dim_out,)

    def __call__(self, y):
        return jnp.dot(y, self.weight) + self.bias


class PreNormPallas:
    """JAX/Pallas equivalent of:
        class PreNorm(nn.Module):
            def __init__(self, dim, fn): self.norm = nn.LayerNorm(dim); self.fn = fn
            def forward(self, x, **kwargs): return self.fn(self.norm(x), **kwargs)
    """

    def __init__(self, dim, fn):
        self.dim = dim
        self.fn = fn
        # nn.LayerNorm default init: weight=1, bias=0.
        self.gamma = jnp.ones((dim,), dtype=jnp.float32)
        self.beta = jnp.zeros((dim,), dtype=jnp.float32)

    def __call__(self, x, **kwargs):
        if isinstance(self.fn, Linear) and not kwargs:
            din, dout = self.fn.weight.shape
            w_bytes = 2 * _round_up(din, _LANE) * _round_up(dout, _LANE) * \
                jnp.dtype(self.fn.weight.dtype).itemsize
            if w_bytes <= _FUSE_WEIGHT_BYTES_CAP:
                return prenorm_linear_pallas(x, self.gamma, self.beta,
                                             self.fn.weight, self.fn.bias)
        # Arbitrary fn: LayerNorm in Pallas, fn in plain JAX.
        return self.fn(layernorm_pallas(x, self.gamma, self.beta), **kwargs)


if __name__ == "__main__":
    batch, seq, dim = 2, 8, 32

    key = jax.random.PRNGKey(0)
    kx, kw, kb = jax.random.split(key, 3)
    x = jax.random.normal(kx, (batch, seq, dim), dtype=jnp.float32)
    w = jax.random.normal(kw, (dim, dim), dtype=jnp.float32) * 0.02
    b = jax.random.normal(kb, (dim,), dtype=jnp.float32) * 0.02

    # Fused path: fn is a Linear whose weight fits VMEM.
    prenorm_fused = PreNormPallas(dim, Linear(w, b))
    out_fused = jax.block_until_ready(prenorm_fused(x))

    # General path: arbitrary callable -> LayerNorm kernel + plain-JAX fn.
    prenorm_general = PreNormPallas(dim, lambda y: jnp.dot(y, w) + b)
    out_general = jax.block_until_ready(prenorm_general(x))

    # Pure-JAX reference.
    mean = jnp.mean(x, axis=-1, keepdims=True)
    var = jnp.mean((x - mean) ** 2, axis=-1, keepdims=True)
    normed = (x - mean) * jax.lax.rsqrt(var + EPS)
    ref = jnp.dot(normed, w) + b

    assert out_fused.shape == (batch, seq, dim)
    assert out_general.shape == (batch, seq, dim)
    assert jnp.allclose(out_fused, ref, atol=1e-4, rtol=1e-4)
    assert jnp.allclose(out_general, ref, atol=1e-4, rtol=1e-4)

    print("KERNEL_OK")
</pallas_src>

<mosaic_0001>
module attributes {stable_mosaic.version = 11 : i64} {
  func.func @_prenorm_linear_kernel(%arg0: i32, %arg1: memref<16x128xf32, #tpu.memory_space<vmem>>, %arg2: memref<1x128xf32, #tpu.memory_space<vmem>>, %arg3: memref<1x128xf32, #tpu.memory_space<vmem>>, %arg4: memref<128x128xf32, #tpu.memory_space<vmem>>, %arg5: memref<1x128xf32, #tpu.memory_space<vmem>>, %arg6: memref<16x128xf32, #tpu.memory_space<vmem>>) attributes {dimension_semantics = [#tpu.dimension_semantics<parallel>], iteration_bounds = array<i64: 1>, scalar_prefetch = 0 : i64, scratch_operands = 0 : i64, tpu.core_type = #tpu.core_type<tc>, window_params = [{transform_indices = @transform_0, window_bounds = array<i64: 16, 128>}, {pipeline_mode = #tpu.pipeline_mode<synchronous>, transform_indices = @transform_1, window_bounds = array<i64: 1, 128>}, {pipeline_mode = #tpu.pipeline_mode<synchronous>, transform_indices = @transform_2, window_bounds = array<i64: 1, 128>}, {pipeline_mode = #tpu.pipeline_mode<synchronous>, transform_indices = @transform_3, window_bounds = array<i64: 128, 128>}, {pipeline_mode = #tpu.pipeline_mode<synchronous>, transform_indices = @transform_4, window_bounds = array<i64: 1, 128>}, {transform_indices = @transform_5, window_bounds = array<i64: 16, 128>}]} {
    %c0 = arith.constant 0 : index
    %c0_0 = arith.constant 0 : index
    %0 = vector.load %arg1[%c0, %c0_0] : memref<16x128xf32, #tpu.memory_space<vmem>>, vector<16x128xf32>
    %1 = tpu.iota {dimensions = array<i32: 1>} : vector<16x128xi32>
    %c32_i32 = arith.constant 32 : i32
    %2 = vector.broadcast %c32_i32 : i32 to vector<16x128xi32>
    %3 = arith.cmpi slt, %1, %2 : vector<16x128xi32>
    %cst = arith.constant 0.000000e+00 : f32
    %4 = vector.broadcast %cst : f32 to vector<16x128xf32>
    %5 = arith.select %3, %0, %4 : vector<16x128xi1>, vector<16x128xf32>
    %cst_1 = arith.constant dense<0.000000e+00> : vector<16xf32>
    %6 = vector.multi_reduction <add>, %5, %cst_1 [1] : vector<16x128xf32> to vector<16xf32>
    %7 = vector.shape_cast %6 : vector<16xf32> to vector<16x1xf32>
    %8 = arith.mulf %5, %5 : vector<16x128xf32>
    %cst_2 = arith.constant dense<0.000000e+00> : vector<16xf32>
    %9 = vector.multi_reduction <add>, %8, %cst_2 [1] : vector<16x128xf32> to vector<16xf32>
    %10 = vector.shape_cast %9 : vector<16xf32> to vector<16x1xf32>
    %cst_3 = arith.constant 3.125000e-02 : f32
    %11 = vector.broadcast %cst_3 : f32 to vector<16x1xf32>
    %12 = arith.mulf %7, %11 : vector<16x1xf32>
    %cst_4 = arith.constant 3.125000e-02 : f32
    %13 = vector.broadcast %cst_4 : f32 to vector<16x1xf32>
    %14 = arith.mulf %10, %13 : vector<16x1xf32>
    %15 = arith.mulf %12, %12 : vector<16x1xf32>
    %16 = arith.subf %14, %15 : vector<16x1xf32>
    %cst_5 = arith.constant 0.000000e+00 : f32
    %17 = vector.broadcast %cst_5 : f32 to vector<16x1xf32>
    %18 = arith.maximumf %16, %17 : vector<16x1xf32>
    %cst_6 = arith.constant 9.99999974E-6 : f32
    %19 = vector.broadcast %cst_6 : f32 to vector<16x1xf32>
    %20 = arith.addf %18, %19 : vector<16x1xf32>
    %21 = math.rsqrt %20 : vector<16x1xf32>
    %c0_7 = arith.constant 0 : index
    %c0_8 = arith.constant 0 : index
    %22 = vector.load %arg2[%c0_7, %c0_8] : memref<1x128xf32, #tpu.memory_space<vmem>>, vector<1x128xf32>
    %c0_9 = arith.constant 0 : index
    %c0_10 = arith.constant 0 : index
    %23 = vector.load %arg3[%c0_9, %c0_10] : memref<1x128xf32, #tpu.memory_space<vmem>>, vector<1x128xf32>
    %24 = vector.broadcast %12 : vector<16x1xf32> to vector<16x128xf32>
    %25 = arith.subf %0, %24 : vector<16x128xf32>
    %26 = vector.broadcast %21 : vector<16x1xf32> to vector<16x128xf32>
    %27 = arith.mulf %25, %26 : vector<16x128xf32>
    %28 = vector.broadcast %22 : vector<1x128xf32> to vector<16x128xf32>
    %29 = arith.mulf %27, %28 : vector<16x128xf32>
    %30 = vector.broadcast %23 : vector<1x128xf32> to vector<16x128xf32>
    %31 = arith.addf %29, %30 : vector<16x128xf32>
    %c0_11 = arith.constant 0 : index
    %c0_12 = arith.constant 0 : index
    %32 = vector.load %arg4[%c0_11, %c0_12] : memref<128x128xf32, #tpu.memory_space<vmem>>, vector<128x128xf32>
    %cst_13 = arith.constant dense<0.000000e+00> : vector<16x128xf32>
    %33 = tpu.matmul %31, %32, %cst_13 {dimension_numbers = #tpu.dot_dimension_numbers<[1], [0], [0], [1], [0, 0, 1, 1], [], []>} : vector<16x128xf32>, vector<128x128xf32>, vector<16x128xf32> -> vector<16x128xf32>
    %c0_14 = arith.constant 0 : index
    %c0_15 = arith.constant 0 : index
    %34 = vector.load %arg5[%c0_14, %c0_15] : memref<1x128xf32, #tpu.memory_space<vmem>>, vector<1x128xf32>
    %35 = vector.broadcast %34 : vector<1x128xf32> to vector<16x128xf32>
    %36 = arith.addf %33, %35 : vector<16x128xf32>
    %c0_16 = arith.constant 0 : index
    %c0_17 = arith.constant 0 : index
    %37 = vector.load %arg6[%c0_16, %c0_17] : memref<16x128xf32, #tpu.memory_space<vmem>>, vector<16x128xf32>
    tpu.vector_store %arg6[%c0_16, %c0_17], %36 {strides = array<i32>} : memref<16x128xf32, #tpu.memory_space<vmem>>, vector<16x128xf32>,
    return
  }
  func.func @transform_0(%arg0: i32) -> (i32, i32) {
    %c0_i32 = arith.constant 0 : i32
    %c0_i32_0 = arith.constant 0 : i32
    return %arg0, %c0_i32 : i32, i32
  }
  func.func @transform_1(%arg0: i32) -> (i32, i32) {
    %c0_i32 = arith.constant 0 : i32
    %c0_i32_0 = arith.constant 0 : i32
    %c0_i32_1 = arith.constant 0 : i32
    return %c0_i32, %c0_i32_0 : i32, i32
  }
  func.func @transform_2(%arg0: i32) -> (i32, i32) {
    %c0_i32 = arith.constant 0 : i32
    %c0_i32_0 = arith.constant 0 : i32
    %c0_i32_1 = arith.constant 0 : i32
    return %c0_i32, %c0_i32_0 : i32, i32
  }
  func.func @transform_3(%arg0: i32) -> (i32, i32) {
    %c0_i32 = arith.constant 0 : i32
    %c0_i32_0 = arith.constant 0 : i32
    %c0_i32_1 = arith.constant 0 : i32
    return %c0_i32, %c0_i32_0 : i32, i32
  }
  func.func @transform_4(%arg0: i32) -> (i32, i32) {
    %c0_i32 = arith.constant 0 : i32
    %c0_i32_0 = arith.constant 0 : i32
    %c0_i32_1 = arith.constant 0 : i32
    return %c0_i32, %c0_i32_0 : i32, i32
  }
  func.func @transform_5(%arg0: i32) -> (i32, i32) {
    %c0_i32 = arith.constant 0 : i32
    %c0_i32_0 = arith.constant 0 : i32
    return %arg0, %c0_i32 : i32, i32
  }
}

</mosaic_0001>

<bundles_post_ra>
// kernel: tpu_custom_call.1
= control target key start
LH: loop header
LB: loop body
LE: loop exit
PB: predicated region body
PF: predicated region fallthrough
CT: control target
= control target key end

     0   :  { %10 = vsyncpa [#allocation3], 0  ;;  %s486_s0 = inlined_call_operand.hbm [shape: f32[16,128], index: 0, kind: input, shape index: {}]   ;;  %s487_s1 = inlined_call_operand.vmem [shape: f32[1,128], index: 1, kind: input, shape index: {}]   ;;  %s488_s2 = inlined_call_operand.vmem [shape: f32[1,128], index: 2, kind: input, shape index: {}]   ;;  %s489_s3 = inlined_call_operand.hbm [shape: f32[128,128], index: 3, kind: input, shape index: {}]   ;;  %s490_s4 = inlined_call_operand.vmem [shape: f32[1,128], index: 4, kind: input, shape index: {}]   ;;  %s491_s5 = inlined_call_operand.hbm [shape: f32[16,128], index: 5, kind: output, shape index: {}]  }
   0x1   :  { %11 = vsyncpa [#allocation6], 0 }
   0x2   :  { %12 = vsyncpa [#allocation4], 0  ;;  %s389_s18 = smov [#allocation2]   ;;  %s317_s22 = scalar_lea.hbm %s486_s0, 256 }
   0x3   :  { %s18_s19 = sshll.u32 %s389_s18, 4  ;;  %p318_p0 = scmp.ne.s32.totalorder %s486_s0, %s317_s22  ;;  %s19_s19 = int_to_ptr.vmem [resolvable:$true] %s18_s19 }
   0x4   :  { %p321_p1 = scmp.lt.u32.totalorder %s317_s22, %s486_s0 }
   0x6   :  { %p323_p2 = pnand %p321_p1, %p318_p0 }
   0x8   :  { %326 = shalt.err (!%p323_p2)
}
   0x9   :  { %s327_s27 = scalar_lea.vmem %s19_s19, 256  ;;  %p332_p4 = scmp.lt.s32.totalorder %s19_s19, %s19_s19 }
   0xa   :  { %p328_p3 = scmp.ne.s32.totalorder %s19_s19, %s327_s27  ;;  %p333_p5 = scmp.lt.s32.totalorder %s327_s27, %s327_s27 }
   0xc   :  { %p334_p6 = por %p333_p5, %p332_p4 }
   0xe   :  { %p335_p7 = pnand %p334_p6, %p328_p3 }
  0x10   :  { %338 = shalt.err (!%p335_p7)
}
  0x11   :  { %s390_s28 = smov 128   ;;  %s391_s29 = smov 8  }
  0x12   :  { %24 = dma.hbm_to_vmem [thread:$0]  %s486_s0, 256, %s19_s19, [#allocation3], %s390_s28, %s390_s28, %s391_s29  }
  0x13   :  { %s392_s7 = smov [#allocation5]   ;;  %s339_s11 = scalar_lea.hbm %s489_s3, 2048 }
  0x14   :  { %s34_s8 = sshll.u32 %s392_s7, 4  ;;  %p340_p8 = scmp.ne.s32.totalorder %s489_s3, %s339_s11  ;;  %s35_s8 = int_to_ptr.vmem [resolvable:$true] %s34_s8 }
  0x15   :  { %p343_p9 = scmp.lt.u32.totalorder %s339_s11, %s489_s3 }
  0x17   :  { %p345_p10 = pnand %p343_p9, %p340_p8 }
  0x19   :  { %348 = shalt.err (!%p345_p10)
}
  0x1a   :  { %s349_s16 = scalar_lea.vmem %s35_s8, 2048  ;;  %p354_p12 = scmp.lt.s32.totalorder %s35_s8, %s35_s8 }
  0x1b   :  { %p350_p11 = scmp.ne.s32.totalorder %s35_s8, %s349_s16  ;;  %p355_p13 = scmp.lt.s32.totalorder %s349_s16, %s349_s16 }
  0x1d   :  { %p356_p0 = por %p355_p13, %p354_p12 }
  0x1f   :  { %p357_p1 = pnand %p356_p0, %p350_p11 }
  0x21   :  { %360 = shalt.err (!%p357_p1)
}
  0x22   :  { %40 = dma.hbm_to_vmem [thread:$0]  %s489_s3, 2048, %s35_s8, [#allocation6], %s390_s28, %s390_s28, %s391_s29  }
  0x23   :  { %383 = dma.done.wait [#allocation3], 256  }
  0x24   :  { %384 = vsyncadd [#allocation3], 4294967040 }
  0x25   :  { %385 = dma.done.wait [#allocation6], 2048  }
  0x26   :  { %386 = vsyncadd [#allocation6], 4294965248  ;;  %v51_v0 = vlaneseq  ;;  %v454_v2 = vld [vmem:[#allocation2] sm:$0xff]  ;;  %v456_v3 = vld [vmem:[#allocation2 + $0x8] sm:$0xff] }
  0x27   :  { %v102_v4 = vld [vmem:[#allocation5] sm:$0xff]  ;;  %v103_v7 = vld [vmem:[#allocation5 + $0x8] sm:$0xff]  ;;  %v104_v11 = vld [vmem:[#allocation5 + $0x10] sm:$0xff] }
  0x28   :  { %v52_v1 = vand.u32 127, %v51_v0  ;;  %v276_v9 = vpack.c.bf16 %v103_v7, %v102_v4  ;;  %v105_v12 = vld [vmem:[#allocation5 + $0x18] sm:$0xff]  ;;  %v106_v14 = vld [vmem:[#allocation5 + $0x20] sm:$0xff]  ;;  %v107_v15 = vld [vmem:[#allocation5 + $0x28] sm:$0xff] }
  0x29   :  { %v280_v13 = vpack.c.bf16 %v105_v12, %v104_v11  ;;  %v284_v16 = vpack.c.bf16 %v107_v15, %v106_v14  ;;  %v108_v17 = vld [vmem:[#allocation5 + $0x30] sm:$0xff]  ;;  %v109_v18 = vld [vmem:[#allocation5 + $0x38] sm:$0xff]  ;;  %v110_v20 = vld [vmem:[#allocation5 + $0x40] sm:$0xff] }
  0x2a   :  { %vm53_vm0 = vcmp.lt.s32.totalorder %v52_v1, 32  ;;  %277 = vmatprep.subr.bf16.mxu0 %v276_v9  ;;  %v288_v19 = vpack.c.bf16 %v109_v18, %v108_v17  ;;  %v111_v21 = vld [vmem:[#allocation5 + $0x48] sm:$0xff]  ;;  %v112_v23 = vld [vmem:[#allocation5 + $0x50] sm:$0xff]  ;;  %v113_v24 = vld [vmem:[#allocation5 + $0x58] sm:$0xff] }
  0x2b   :  { %v54_v5 = vsel %vm53_vm0, %v454_v2, 0.0  ;;  %v55_v6 = vsel %vm53_vm0, %v456_v3, 0.0  ;;  %279 = vmatpush3.bf16.msra.mxu0 %v276_v9  ;;  %v292_v22 = vpack.c.bf16 %v111_v21, %v110_v20  ;;  %v114_v25 = vld [vmem:[#allocation5 + $0x60] sm:$0xff]  ;;  %v296_v26 = vpack.c.bf16 %v113_v24, %v112_v23  ;;  %v115_v27 = vld [vmem:[#allocation5 + $0x68] sm:$0xff]  ;;  %v116_v29 = vld [vmem:[#allocation5 + $0x70] sm:$0xff] }
  0x2c   :  { %56 = vadd.xlane.f32.xlu0 %v54_v5  ;;  %v60_v8 = vmul.f32 %v54_v5, %v54_v5  ;;  %v61_v10 = vmul.f32 %v55_v6, %v55_v6  ;;  %281 = vmatprep.subr.bf16.mxu0 %v280_v13  ;;  %v300_v28 = vpack.c.bf16 %v115_v27, %v114_v25  ;;  %v117_v30 = vld [vmem:[#allocation5 + $0x78] sm:$0xff]  ;;  %v220_v50 = vld [vmem:[%s487_s1] ss:$0 sm:$0xff]  ;;  %s393_s1 = smov [#allocation7]  }
  0x2d   :  { %v304_v31 = vpack.c.bf16 %v117_v30, %v116_v29  ;;  %v221_v52 = vld [vmem:[%s488_s2] ss:$0 sm:$0xff]  ;;  %s207_s23 = sshll.u32 %s393_s1, 4  ;;  %s208_s23 = int_to_ptr.vmem [resolvable:$true] %s207_s23 }
  0x2e   :  { %62 = vadd.xlane.f32.xlu1 %v60_v8  ;;  %v222_v60 = vld [vmem:[%s490_s4] ss:$0 sm:$0xff]  ;;  %s361_s2 = scalar_lea.vmem %s208_s23, 256  ;;  %p366_p3 = scmp.lt.s32.totalorder %s208_s23, %s208_s23 }
  0x2f   :  { %283 = vmatpush3.bf16.msra.mxu0 %v280_v13  ;;  %p362_p2 = scmp.ne.s32.totalorder %s208_s23, %s361_s2  ;;  %p367_p4 = scmp.lt.s32.totalorder %s361_s2, %s361_s2 }
  0x30   :  { %58 = vadd.xlane.f32.xlu0 %v55_v6  ;;  %285 = vmatprep.subr.bf16.mxu0 %v284_v16 }
  0x31   :  { %p368_p5 = por %p367_p4, %p366_p3 }
  0x32   :  { %64 = vadd.xlane.f32.xlu1 %v61_v10 }
  0x33   :  { %287 = vmatpush3.bf16.msra.mxu0 %v284_v16  ;;  %p369_p6 = pnand %p368_p5, %p362_p2 }
  0x34   :  { %289 = vmatprep.subr.bf16.mxu0 %v288_v19 }
  0x37   :  { %291 = vmatpush3.bf16.msra.mxu0 %v288_v19 }
  0x38   :  { %293 = vmatprep.subr.bf16.mxu0 %v292_v22 }
  0x3b   :  { %295 = vmatpush3.bf16.msra.mxu0 %v292_v22 }
  0x3c   :  { %297 = vmatprep.subr.bf16.mxu0 %v296_v26 }
  0x3f   :  { %299 = vmatpush3.bf16.msra.mxu0 %v296_v26 }
  0x40   :  { %301 = vmatprep.subr.bf16.mxu0 %v300_v28 }
  0x43   :  { %303 = vmatpush3.bf16.msra.mxu0 %v300_v28 }
  0x44   :  { %305 = vmatprep.subr.bf16.mxu0 %v304_v31 }
  0x47   :  { %307 = vmatpush3.bf16.msra.mxu0 %v304_v31 }
  0xb9   :  { %v57_v32 = vpop.xlane.xlu0 %56 }
  0xba   :  { %v66_v33 = vmul.f32 0.03125, %v57_v32 }
  0xbb   :  { %v63_v34 = vpop.xlane.xlu1 %62 }
  0xbc   :  { %v70_v35 = vmul.f32 %v66_v33, %v66_v33  ;;  %v68_v36 = vmul.f32 0.03125, %v63_v34  ;;  %v82_v48 = vsub.f32 %v454_v2, %v66_v33 }
  0xbd   :  { %v59_v37 = vpop.xlane.xlu0 %58 }
  0xbe   :  { %v72_v38 = vsub.f32 %v68_v36, %v70_v35  ;;  %v67_v39 = vmul.f32 0.03125, %v59_v37 }
  0xbf   :  { %v65_v40 = vpop.xlane.xlu1 %64 }
  0xc0   :  { %v74_v41 = vmax.f32 %v72_v38, 0.0  ;;  %v71_v42 = vmul.f32 %v67_v39, %v67_v39  ;;  %v69_v43 = vmul.f32 0.03125, %v65_v40  ;;  %v83_v53 = vsub.f32 %v456_v3, %v67_v39 }
  0xc2   :  { %v76_v44 = vadd.f32 1e-05, %v74_v41  ;;  %v73_v45 = vsub.f32 %v69_v43, %v71_v42 }
  0xc4   :  { %313 = vrsqrt.f32 %v76_v44  ;;  %v75_v46 = vmax.f32 %v73_v45, 0.0 }
  0xc6   :  { %v77_v47 = vadd.f32 1e-05, %v75_v46 }
  0xc8   :  { %315 = vrsqrt.f32 %v77_v47 }
  0xce   :  { %v314_v49 = vpop.eup %313 }
  0xcf   :  { %v84_v51 = vmul.f32 %v314_v49, %v82_v48 }
  0xd1   :  { %v92_v54 = vmul.f32 %v220_v50, %v84_v51 }
  0xd2   :  { %v316_v55 = vpop.eup %315 }
  0xd3   :  { %v85_v56 = vmul.f32 %v316_v55, %v83_v53  ;;  %v100_v57 = vadd.f32 %v221_v52, %v92_v54 }
  0xd5   :  { %v93_v58 = vmul.f32 %v220_v50, %v85_v56  ;;  %273 = vmatprep.mubr.f32.mxu0 %v100_v57 }
  0xd7   :  { %v101_v59 = vadd.f32 %v221_v52, %v93_v58 }
  0xd9   :  { %274 = vmatmul.mubr.f32.vlgmr.msra.gmra.mrb[0].mxu0 %v101_v59 }
 0x1ac   :  { %v275_v61 = vpop.f32.mrb[0].mxu0 }
 0x1ad   :  { %v197_v62 = vadd.f32 %v275_v61, %v222_v60  ;;  %v191_v63 = vpop.f32.mrb[1].mxu0 }
 0x1ae   :  { %v192_v0 = vadd.f32 %v222_v60, %v191_v63 }
 0x1af   :  { %201 = vst [vmem:[#allocation7 + $0x8] sm:$0xff] %v197_v62 }
 0x1b0   :  { %200 = vst [vmem:[#allocation7] sm:$0xff] %v192_v0 }
 0x1b1   :  { %372 = shalt.err (!%p369_p6)
}
 0x1b2   :  { %s373_s4 = scalar_lea.hbm %s491_s5, 256 }
 0x1b3   :  { %p374_p7 = scmp.ne.s32.totalorder %s491_s5, %s373_s4  ;;  %p377_p8 = scmp.lt.u32.totalorder %s373_s4, %s491_s5 }
 0x1b5   :  { %p379_p9 = pnand %p377_p8, %p374_p7 }
 0x1b7   :  { %382 = shalt.err (!%p379_p9)
}
 0x1b8   :  { %213 = dma.vmem_to_hbm [thread:$0]  %s208_s23, 256, %s491_s5, [#allocation4], %s390_s28, %s390_s28, %s391_s29  }
 0x1b9   :  { %387 = dma.done.wait [#allocation4], 256  }
 0x1ba   :  { %388 = vsyncadd [#allocation4], 4294967040 }
 0x1bb   :  { %217 = vsyncpa [#allocation3], 1 }
 0x1bc   :  { %218 = vsyncpa [#allocation6], 1 }
 0x1bd   :  { %219 = vsyncpa [#allocation4], 1 }

</bundles_post_ra>
